<compile_context>
chip_gen: v6e
topology: v6e:2x2x1
jax: 0.10.0
libtpu: 0.0.40
codegen_flags: <defaults>
</compile_context>

<pallas_src>
import functools
import math

import jax
import jax.numpy as jnp
from jax.experimental import pallas as pl
from jax.experimental.pallas import tpu as pltpu


def make_positional_table(embedding_size: int, maxlen: int = 5000) -> jnp.ndarray:
    """Replicates the buffer built in PositionalEncoding.__init__ (f32, (maxlen,1,E))."""
    den = jnp.exp(
        -jnp.arange(0, embedding_size, 2, dtype=jnp.float32)
        * (math.log(10000.0) / embedding_size)
    )  # (E/2,)
    pos = jnp.arange(0, maxlen, dtype=jnp.float32).reshape(maxlen, 1)  # (maxlen, 1)
    angles = pos * den  # (maxlen, E/2)
    pe = jnp.zeros((maxlen, embedding_size), dtype=jnp.float32)
    pe = pe.at[:, 0::2].set(jnp.sin(angles))
    pe = pe.at[:, 1::2].set(jnp.cos(angles))
    return pe[:, None, :]  # (maxlen, 1, E)


def _pe_add_kernel(x_ref, pe_ref, o_ref):
    # Pure elementwise add, lane-dense (rows, E) tile.
    o_ref[...] = x_ref[...] + pe_ref[...]


def _pe_add_dropout_kernel(x_ref, pe_ref, u_ref, o_ref, *, dropout_p: float):
    # Inverted dropout: keep with prob (1-p), scale kept elements by 1/(1-p).
    y = x_ref[...] + pe_ref[...]
    keep = u_ref[...] >= jnp.float32(dropout_p)
    scale = jnp.asarray(1.0 / (1.0 - dropout_p), dtype=y.dtype)
    o_ref[...] = jnp.where(keep, y * scale, jnp.zeros_like(y))


def _choose_row_tile(n_rows: int, lane_dim: int, itemsize: int,
                     target_bytes: int = 1 << 20) -> int:
    """Pick a row tile of ~target_bytes per block, multiple of 8."""
    rt = min(n_rows, max(8, target_bytes // max(1, lane_dim * itemsize)))
    rt = max(8, (rt // 8) * 8)
    return rt


def positional_encoding_forward(
    token_embedding: jnp.ndarray,   # (S, B, E)
    pe_table: jnp.ndarray,          # (maxlen, 1, E) float32 buffer
    dropout_p: float,
    rng_key=None,
) -> jnp.ndarray:
    S, B, E = token_embedding.shape
    dtype = token_embedding.dtype
    R = S * B

    # Lane-dense 2D view: row r = (s*B + b), columns = embedding dim.
    x2d = token_embedding.reshape(R, E)
    # Broadcast the (S, E) table over batch once (row r uses position r // B).
    pe_rows = jnp.repeat(pe_table[:S, 0, :], B, axis=0).astype(dtype)  # (R, E)

    rt = _choose_row_tile(R, E, jnp.dtype(dtype).itemsize)
    num_blocks = (R + rt - 1) // rt
    Rp = num_blocks * rt
    if Rp != R:
        pad = Rp - R
        x2d = jnp.pad(x2d, ((0, pad), (0, 0)))
        pe_rows = jnp.pad(pe_rows, ((0, pad), (0, 0)))

    grid = (num_blocks,)
    tile_spec = pl.BlockSpec((rt, E), lambda i: (i, 0))
    cparams = pltpu.CompilerParams(
        dimension_semantics=("parallel",),       # independent tiles; v7x 2-TC sharding
        vmem_limit_bytes=32 * 1024 * 1024,       # explicit budget, safe on v5e..v7x
    )

    if dropout_p > 0.0:
        if rng_key is None:
            rng_key = jax.random.PRNGKey(0)
        # TODO(synk): on real TPU hardware the uniforms could be generated
        # in-kernel with pltpu.prng_random_bits to save one HBM read stream;
        # it is kept host-side here because prng_seed does not lower in the
        # interpret/CPU path used for validation.
        u = jax.random.uniform(rng_key, (Rp, E), dtype=jnp.float32)
        kernel = functools.partial(_pe_add_dropout_kernel, dropout_p=float(dropout_p))
        out2d = pl.pallas_call(
            kernel,
            out_shape=jax.ShapeDtypeStruct((Rp, E), dtype),
            grid=grid,
            in_specs=[tile_spec, tile_spec, pl.BlockSpec((rt, E), lambda i: (i, 0))],
            out_specs=tile_spec,
            compiler_params=cparams,
        )(x2d, pe_rows, u)
    else:
        out2d = pl.pallas_call(
            _pe_add_kernel,
            out_shape=jax.ShapeDtypeStruct((Rp, E), dtype),
            grid=grid,
            in_specs=[tile_spec, tile_spec],
            out_specs=tile_spec,
            compiler_params=cparams,
        )(x2d, pe_rows)

    return out2d[:R].reshape(S, B, E)


if __name__ == "__main__":
    SEQ, BATCH, EMB = 8, 2, 32
    MAXLEN = 64
    DROPOUT = 0.1

    key = jax.random.PRNGKey(0)
    k_x, k_drop = jax.random.split(key)
    x = jax.random.normal(k_x, (SEQ, BATCH, EMB), dtype=jnp.float32)

    pe_table = make_positional_table(EMB, MAXLEN)

    # Deterministic path (dropout disabled) vs reference.
    out_nodrop = positional_encoding_forward(x, pe_table, 0.0)
    out_nodrop = jax.block_until_ready(out_nodrop)
    ref = x + pe_table[:SEQ]  # (S,1,E) broadcasts over batch
    assert jnp.allclose(out_nodrop, ref, atol=1e-6), "mismatch vs reference (no dropout)"

    # Training-mode dropout path (mask generated with jax.random, applied in-kernel).
    out = positional_encoding_forward(x, pe_table, DROPOUT, rng_key=k_drop)
    out = jax.block_until_ready(out)
    assert out.shape == (SEQ, BATCH, EMB)
    # Kept elements must equal scaled reference; dropped elements are exactly 0.
    scale = 1.0 / (1.0 - DROPOUT)
    nz = out != 0
    assert jnp.allclose(jnp.where(nz, out, ref * scale), ref * scale, atol=1e-5), \
        "dropout-kept elements do not match scaled reference"

    print("KERNEL_OK")
</pallas_src>

<mosaic_0001>
module attributes {stable_mosaic.version = 11 : i64} {
  func.func @_pe_add_kernel(%arg0: i32, %arg1: memref<16x32xf32, #tpu.memory_space<vmem>>, %arg2: memref<16x32xf32, #tpu.memory_space<vmem>>, %arg3: memref<16x32xf32, #tpu.memory_space<vmem>>) attributes {dimension_semantics = [#tpu.dimension_semantics<parallel>], iteration_bounds = array<i64: 1>, scalar_prefetch = 0 : i64, scratch_operands = 0 : i64, tpu.core_type = #tpu.core_type<tc>, window_params = [{transform_indices = @transform_0, window_bounds = array<i64: 16, 32>}, {transform_indices = @transform_1, window_bounds = array<i64: 16, 32>}, {transform_indices = @transform_2, window_bounds = array<i64: 16, 32>}]} {
    %c0 = arith.constant 0 : index
    %c0_0 = arith.constant 0 : index
    %0 = vector.load %arg1[%c0, %c0_0] : memref<16x32xf32, #tpu.memory_space<vmem>>, vector<16x32xf32>
    %c0_1 = arith.constant 0 : index
    %c0_2 = arith.constant 0 : index
    %1 = vector.load %arg2[%c0_1, %c0_2] : memref<16x32xf32, #tpu.memory_space<vmem>>, vector<16x32xf32>
    %2 = arith.addf %0, %1 : vector<16x32xf32>
    %c0_3 = arith.constant 0 : index
    %c0_4 = arith.constant 0 : index
    %3 = vector.load %arg3[%c0_3, %c0_4] : memref<16x32xf32, #tpu.memory_space<vmem>>, vector<16x32xf32>
    tpu.vector_store %arg3[%c0_3, %c0_4], %2 {strides = array<i32>} : memref<16x32xf32, #tpu.memory_space<vmem>>, vector<16x32xf32>,
    return
  }
  func.func @transform_0(%arg0: i32) -> (i32, i32) {
    %c0_i32 = arith.constant 0 : i32
    %c0_i32_0 = arith.constant 0 : i32
    return %arg0, %c0_i32 : i32, i32
  }
  func.func @transform_1(%arg0: i32) -> (i32, i32) {
    %c0_i32 = arith.constant 0 : i32
    %c0_i32_0 = arith.constant 0 : i32
    return %arg0, %c0_i32 : i32, i32
  }
  func.func @transform_2(%arg0: i32) -> (i32, i32) {
    %c0_i32 = arith.constant 0 : i32
    %c0_i32_0 = arith.constant 0 : i32
    return %arg0, %c0_i32 : i32, i32
  }
}

</mosaic_0001>

<bundles_post_ra>
// kernel: tpu_custom_call.1
= control target key start
LH: loop header
LB: loop body
LE: loop exit
PB: predicated region body
PF: predicated region fallthrough
CT: control target
= control target key end

     0   :  { %7 = vsyncpa [#allocation3], 0  ;;  %s176_s0 = inlined_call_operand.hbm [shape: f32[16,32], index: 0, kind: input, shape index: {}]   ;;  %s177_s1 = inlined_call_operand.hbm [shape: f32[16,32], index: 1, kind: input, shape index: {}]   ;;  %s178_s2 = inlined_call_operand.hbm [shape: f32[16,32], index: 2, kind: output, shape index: {}]  }
   0x1   :  { %8 = vsyncpa [#allocation6], 0 }
   0x2   :  { %9 = vsyncpa [#allocation4], 0  ;;  %s138_s9 = smov [#allocation2]  }
   0x3   :  { %s15_s10 = sshll.u32 %s138_s9, 4  ;;  %s16_s10 = int_to_ptr.vmem [resolvable:$true] %s15_s10 }
   0x4   :  { %s80_s11 = scalar_lea.vmem %s16_s10, 256  ;;  %p85_p1 = scmp.lt.s32.totalorder %s16_s10, %s16_s10 }
   0x5   :  { %p81_p0 = scmp.ne.s32.totalorder %s16_s10, %s80_s11  ;;  %p86_p2 = scmp.lt.s32.totalorder %s80_s11, %s80_s11 }
   0x7   :  { %p87_p3 = por %p86_p2, %p85_p1 }
   0x9   :  { %p88_p4 = pnand %p87_p3, %p81_p0 }
   0xb   :  { %91 = shalt.err (!%p88_p4)
}
   0xc   :  { %s139_s12 = smov 128   ;;  %s140_s13 = smov 8  }
   0xd   :  { %21 = dma.hbm_to_vmem [thread:$0]  %s176_s0, 256, %s16_s10, [#allocation3], %s139_s12, %s139_s12, %s140_s13  }
   0xe   :  { %s141_s16 = smov [#allocation5]  }
   0xf   :  { %s27_s17 = sshll.u32 %s141_s16, 4  ;;  %s28_s17 = int_to_ptr.vmem [resolvable:$true] %s27_s17 }
  0x10   :  { %s100_s18 = scalar_lea.vmem %s28_s17, 256  ;;  %p105_p6 = scmp.lt.s32.totalorder %s28_s17, %s28_s17 }
  0x11   :  { %p101_p5 = scmp.ne.s32.totalorder %s28_s17, %s100_s18  ;;  %p106_p7 = scmp.lt.s32.totalorder %s100_s18, %s100_s18 }
  0x13   :  { %p107_p8 = por %p106_p7, %p105_p6 }
  0x15   :  { %p108_p9 = pnand %p107_p8, %p101_p5 }
  0x17   :  { %111 = shalt.err (!%p108_p9)
}
  0x18   :  { %33 = dma.hbm_to_vmem [thread:$0]  %s177_s1, 256, %s28_s17, [#allocation6], %s139_s12, %s139_s12, %s140_s13  }
  0x19   :  { %132 = dma.done.wait [#allocation3], 256  }
  0x1a   :  { %133 = vsyncadd [#allocation3], 4294967040 }
  0x1b   :  { %134 = dma.done.wait [#allocation6], 256  }
  0x1c   :  { %135 = vsyncadd [#allocation6], 4294967040  ;;  %s142_s0 = smov [#allocation7]   ;;  %v40_v0 = vld [vmem:[#allocation2] sm:$0xff]  ;;  %v42_v1 = vld [vmem:[#allocation5] sm:$0xff]  ;;  %vm46_vm0 = vcmask 261120  }
  0x1d   :  { %s54_s21 = sshll.u32 %s142_s0, 4  ;;  %v41_v2 = vld [vmem:[#allocation2 + $0x8] sm:$0xff]  ;;  %v44_v3 = vadd.f32 %v42_v1, %v40_v0  ;;  %v43_v4 = vld [vmem:[#allocation5 + $0x8] sm:$0xff]  ;;  %s55_s21 = int_to_ptr.vmem [resolvable:$true] %s54_s21 }
  0x1e   :  { %v45_v5 = vadd.f32 %v43_v4, %v41_v2  ;;  %s112_s22 = scalar_lea.vmem %s55_s21, 256  ;;  %p117_p11 = scmp.lt.s32.totalorder %s55_s21, %s55_s21 }
  0x1f   :  { %47 = vst.msk [vmem:[#allocation7] sm:$0xff] %vm46_vm0, %v44_v3  ;;  %p113_p10 = scmp.ne.s32.totalorder %s55_s21, %s112_s22  ;;  %p118_p12 = scmp.lt.s32.totalorder %s112_s22, %s112_s22 }
  0x20   :  { %48 = vst.msk [vmem:[#allocation7 + $0x8] sm:$0xff] %vm46_vm0, %v45_v5 }
  0x21   :  { %p119_p13 = por %p118_p12, %p117_p11 }
  0x23   :  { %p120_p0 = pnand %p119_p13, %p113_p10 }
  0x25   :  { %123 = shalt.err (!%p120_p0)
}
  0x26   :  { %60 = dma.vmem_to_hbm [thread:$0]  %s55_s21, 256, %s178_s2, [#allocation4], %s139_s12, %s139_s12, %s140_s13  }
  0x27   :  { %136 = dma.done.wait [#allocation4], 256  }
  0x28   :  { %137 = vsyncadd [#allocation4], 4294967040 }
  0x29   :  { %64 = vsyncpa [#allocation3], 1 }
  0x2a   :  { %65 = vsyncpa [#allocation6], 1 }
  0x2b   :  { %66 = vsyncpa [#allocation4], 1 }

</bundles_post_ra>
